<compile_context>
chip_gen: v5e
topology: v5e:2x2
jax: 0.10.0
libtpu: 0.0.40
codegen_flags: <defaults>
</compile_context>

<pallas_src>
import jax
import jax.numpy as jnp
from jax.experimental import pallas as pl
from jax.experimental.pallas import tpu as pltpu

HIDDEN = 64
N_HEADS = 2      # fc_linear + fc_angular fused into one (2, 64) head
LANE = 128       # TPU lane width; batch tiles are multiples of this


def _round_up(n, m):
    return ((n + m - 1) // m) * m


def actor_kernel(x_ref, w1_ref, b1_ref, w2_ref, b2_ref, wh_ref, bh_ref, mean_ref):
    """One batch tile. Activations are (features, tile_b): batch on the lane axis."""
    x = x_ref[...].astype(jnp.bfloat16)                        # (tile_b, n_states)

    # h1^T = W1 @ x^T via a trans_b contraction (rhs contracts on its last dim),
    # avoiding any HBM or in-kernel transpose of x.  bf16 MXU operands, f32 accum.
    h1 = jax.lax.dot_general(
        w1_ref[...], x, (((1,), (1,)), ((), ())),
        preferred_element_type=jnp.float32)                    # (HIDDEN, tile_b) f32
    h1 = jnp.maximum(h1 + b1_ref[...], 0.0)                    # f32 bias + relu (VPU)

    h2 = jnp.dot(w2_ref[...], h1.astype(jnp.bfloat16),
                 preferred_element_type=jnp.float32)           # (HIDDEN, tile_b) f32
    h2 = jnp.maximum(h2 + b2_ref[...], 0.0)

    # Fused bf16 head; the tanh 2x pre-scale is already folded into row 1 of wh/bh.
    logits = jnp.dot(wh_ref[...], h2.astype(jnp.bfloat16),
                     preferred_element_type=jnp.float32) + bh_ref[...]  # (2, tile_b)
    s = jax.nn.sigmoid(logits)                                 # f32 EUP, lane-dense

    # row 0: mean_linear = sigmoid(z); row 1: mean_angular = tanh(z) = 2*sigmoid(2z)-1
    mean_ref[0:1, :] = s[0:1, :]
    mean_ref[1:2, :] = 2.0 * s[1:2, :] - 1.0


def _choose_tile_b(batch, tile_b):
    """Lane-dense batch tile (multiple of 128), capped so v7x megacore sees >=2 steps."""
    t = _round_up(max(1, min(tile_b, batch)), LANE)
    half = _round_up(pl.cdiv(batch, 2), LANE)
    if batch > LANE and half < t:
        t = half
    return t


def actor_forward(x, kernel_params, *, tile_b=8192):
    """Actor forward pass. Returns (mean, std), each (B, N_HEADS) float32."""
    w1, b1, w2, b2, wh, bh, std = (kernel_params[k] for k in
                                   ("w1", "b1", "w2", "b2", "wh", "bh", "std"))
    B, n_states = x.shape

    t = _choose_tile_b(B, tile_b)
    b_pad = _round_up(B, t)
    if b_pad != B:
        x = jnp.pad(x, ((0, b_pad - B), (0, 0)))
    grid = (b_pad // t,)

    flops = 2 * b_pad * (n_states * HIDDEN + HIDDEN * HIDDEN + HIDDEN * N_HEADS)
    transcendentals = b_pad * N_HEADS                           # one sigmoid per output
    bytes_accessed = (b_pad * (n_states + N_HEADS) * 4          # x in, mean out
                      + (w1.size + w2.size + wh.size) * 2       # bf16 weights
                      + (b1.size + b2.size + bh.size) * 4)

    mean_t = pl.pallas_call(
        actor_kernel,
        out_shape=jax.ShapeDtypeStruct((N_HEADS, b_pad), jnp.float32),
        grid=grid,
        in_specs=[
            pl.BlockSpec((t, n_states), lambda i: (i, 0)),       # x: batch-tiled
            pl.BlockSpec((HIDDEN, n_states), lambda i: (0, 0)),  # w1 (resident, bf16)
            pl.BlockSpec((HIDDEN, 1), lambda i: (0, 0)),         # b1 (resident, f32)
            pl.BlockSpec((HIDDEN, HIDDEN), lambda i: (0, 0)),    # w2 (resident, bf16)
            pl.BlockSpec((HIDDEN, 1), lambda i: (0, 0)),         # b2 (resident, f32)
            pl.BlockSpec((N_HEADS, HIDDEN), lambda i: (0, 0)),   # wh (fused, folded)
            pl.BlockSpec((N_HEADS, 1), lambda i: (0, 0)),        # bh (fused, folded)
        ],
        out_specs=pl.BlockSpec((N_HEADS, t), lambda i: (0, i)),  # lane-dense output
        compiler_params=pltpu.CompilerParams(
            dimension_semantics=("parallel",),      # megacore on v7x
            vmem_limit_bytes=32 * 1024 * 1024,      # right-sized (< v7x 64 MiB physical)
        ),
        cost_estimate=pl.CostEstimate(
            flops=int(flops),
            transcendentals=int(transcendentals),
            bytes_accessed=int(bytes_accessed),
        ),
    )(x, w1, b1, w2, b2, wh, bh)

    mean = mean_t[:, :B].T                      # tiny (2, B) -> (B, 2) transpose
    std_b = jnp.broadcast_to(std, mean.shape).astype(jnp.float32)
    return mean, std_b


def prepare_params(params):
    """One-time conversion of PyTorch-layout params to the kernel-ready pytree.

    Hoists the bf16 weight casts (done once, not per forward), fuses + pre-scales
    the two heads (tanh(z) = 2*sigmoid(2z) - 1), reshapes biases to (features, 1)
    for the batch-on-lanes layout, and precomputes std = exp(log_std).
    """
    w1, b1, w2, b2, w_lin, b_lin, w_ang, b_ang, log_std = params
    wh = jnp.concatenate([w_lin, 2.0 * w_ang], axis=0)                    # (2, 64)
    bh = jnp.concatenate([b_lin, 2.0 * b_ang], axis=0).reshape(N_HEADS, 1)
    return dict(
        w1=w1.astype(jnp.bfloat16),                                       # (64, n_states)
        b1=b1.reshape(HIDDEN, 1).astype(jnp.float32),
        w2=w2.astype(jnp.bfloat16),                                       # (64, 64)
        b2=b2.reshape(HIDDEN, 1).astype(jnp.float32),
        wh=wh.astype(jnp.bfloat16),
        bh=bh.astype(jnp.float32),
        std=jnp.exp(log_std).astype(jnp.float32),                         # (2,)
    )


def init_params(key, n_states):
    """Deterministic synthetic init matching nn.Linear defaults (PyTorch layout)."""
    keys = jax.random.split(key, 8)

    def uniform_linear(k, fan_in, shape):
        bound = 1.0 / jnp.sqrt(jnp.float32(fan_in))
        return jax.random.uniform(k, shape, jnp.float32, -bound, bound)

    w1 = uniform_linear(keys[0], n_states, (HIDDEN, n_states))
    b1 = uniform_linear(keys[1], n_states, (HIDDEN,))
    w2 = uniform_linear(keys[2], HIDDEN, (HIDDEN, HIDDEN))
    b2 = uniform_linear(keys[3], HIDDEN, (HIDDEN,))
    w_lin = uniform_linear(keys[4], HIDDEN, (1, HIDDEN))
    b_lin = uniform_linear(keys[5], HIDDEN, (1,))
    w_ang = uniform_linear(keys[6], HIDDEN, (1, HIDDEN))
    b_ang = uniform_linear(keys[7], HIDDEN, (1,))
    log_std = jnp.array([-4.0, -2.5], dtype=jnp.float32)
    return (w1, b1, w2, b2, w_lin, b_lin, w_ang, b_ang, log_std)


def actor_reference(x, params):
    """Pure-f32 JAX reference of the PyTorch forward."""
    w1, b1, w2, b2, w_lin, b_lin, w_ang, b_ang, log_std = params
    h1 = jax.nn.relu(x @ w1.T + b1)
    h2 = jax.nn.relu(h1 @ w2.T + b2)
    mean = jnp.concatenate(
        [jax.nn.sigmoid(h2 @ w_lin.T + b_lin), jnp.tanh(h2 @ w_ang.T + b_ang)],
        axis=-1)
    std = jnp.broadcast_to(jnp.exp(log_std), mean.shape)
    return mean, std


def actor_reference_bf16(x, params):
    """Reference mirroring the kernel's bf16-MXU / f32-accumulate arithmetic."""
    w1, b1, w2, b2, w_lin, b_lin, w_ang, b_ang, log_std = params
    c = lambda a: a.astype(jnp.bfloat16)
    h1 = jax.nn.relu(jnp.dot(c(x), c(w1).T, preferred_element_type=jnp.float32) + b1)
    h2 = jax.nn.relu(jnp.dot(c(h1), c(w2).T, preferred_element_type=jnp.float32) + b2)
    z_lin = jnp.dot(c(h2), c(w_lin).T, preferred_element_type=jnp.float32) + b_lin
    z_ang = jnp.dot(c(h2), c(w_ang).T, preferred_element_type=jnp.float32) + b_ang
    mean = jnp.concatenate([jax.nn.sigmoid(z_lin), jnp.tanh(z_ang)], axis=-1)
    std = jnp.broadcast_to(jnp.exp(log_std), mean.shape)
    return mean, std


if __name__ == "__main__":
    n_states = 32
    key = jax.random.PRNGKey(0)
    kx, kp = jax.random.split(key)
    params = init_params(kp, n_states)
    kernel_params = prepare_params(params)   # bf16 casts / head folding done once

    # small case + a case exercising multi-tile grid, padding, and the megacore cap.
    for batch in (8, 300):
        x = jax.random.normal(kx, (batch, n_states), dtype=jnp.float32)

        mean, std = jax.block_until_ready(actor_forward(x, kernel_params))

        ref_mean_b, ref_std = actor_reference_bf16(x, params)
        ref_mean_f, _ = actor_reference(x, params)

        assert mean.shape == (batch, N_HEADS) and std.shape == (batch, N_HEADS)
        assert jnp.allclose(mean, ref_mean_b, atol=2e-3, rtol=2e-3), \
            f"mean mismatch vs bf16-mirrored reference (batch={batch})"
        assert jnp.allclose(mean, ref_mean_f, atol=5e-2, rtol=5e-2), \
            f"mean mismatch vs f32 reference (batch={batch})"
        assert jnp.allclose(std, ref_std, atol=1e-6, rtol=1e-6), \
            f"std mismatch (batch={batch})"

    print("KERNEL_OK")
</pallas_src>

<mosaic_0001>
module attributes {stable_mosaic.version = 11 : i64} {
  func.func @actor_kernel(%arg0: i32, %arg1: memref<128x32xf32, #tpu.memory_space<vmem>>, %arg2: memref<64x32xbf16, #tpu.memory_space<vmem>>, %arg3: memref<64x1xf32, #tpu.memory_space<vmem>>, %arg4: memref<64x64xbf16, #tpu.memory_space<vmem>>, %arg5: memref<64x1xf32, #tpu.memory_space<vmem>>, %arg6: memref<2x64xbf16, #tpu.memory_space<vmem>>, %arg7: memref<2x1xf32, #tpu.memory_space<vmem>>, %arg8: memref<2x128xf32, #tpu.memory_space<vmem>>) attributes {dimension_semantics = [#tpu.dimension_semantics<parallel>], iteration_bounds = array<i64: 1>, scalar_prefetch = 0 : i64, scratch_operands = 0 : i64, tpu.core_type = #tpu.core_type<tc>, window_params = [{transform_indices = @transform_0, window_bounds = array<i64: 128, 32>}, {pipeline_mode = #tpu.pipeline_mode<synchronous>, transform_indices = @transform_1, window_bounds = array<i64: 64, 32>}, {pipeline_mode = #tpu.pipeline_mode<synchronous>, transform_indices = @transform_2, window_bounds = array<i64: 64, 1>}, {pipeline_mode = #tpu.pipeline_mode<synchronous>, transform_indices = @transform_3, window_bounds = array<i64: 64, 64>}, {pipeline_mode = #tpu.pipeline_mode<synchronous>, transform_indices = @transform_4, window_bounds = array<i64: 64, 1>}, {pipeline_mode = #tpu.pipeline_mode<synchronous>, transform_indices = @transform_5, window_bounds = array<i64: 2, 64>}, {pipeline_mode = #tpu.pipeline_mode<synchronous>, transform_indices = @transform_6, window_bounds = array<i64: 2, 1>}, {transform_indices = @transform_7, window_bounds = array<i64: 2, 128>}]} {
    %c0 = arith.constant 0 : index
    %c0_0 = arith.constant 0 : index
    %0 = vector.load %arg1[%c0, %c0_0] : memref<128x32xf32, #tpu.memory_space<vmem>>, vector<128x32xf32>
    %1 = arith.truncf %0 : vector<128x32xf32> to vector<128x32xbf16>
    %c0_1 = arith.constant 0 : index
    %c0_2 = arith.constant 0 : index
    %2 = vector.load %arg2[%c0_1, %c0_2] : memref<64x32xbf16, #tpu.memory_space<vmem>>, vector<64x32xbf16>
    %cst = arith.constant dense<0.000000e+00> : vector<64x128xf32>
    %3 = tpu.matmul %2, %1, %cst {dimension_numbers = #tpu.dot_dimension_numbers<[1], [1], [0], [0], [0, 0, 1, 0], [], []>} : vector<64x32xbf16>, vector<128x32xbf16>, vector<64x128xf32> -> vector<64x128xf32>
    %c0_3 = arith.constant 0 : index
    %c0_4 = arith.constant 0 : index
    %4 = vector.load %arg3[%c0_3, %c0_4] : memref<64x1xf32, #tpu.memory_space<vmem>>, vector<64x1xf32>
    %5 = vector.broadcast %4 : vector<64x1xf32> to vector<64x128xf32>
    %6 = arith.addf %3, %5 : vector<64x128xf32>
    %cst_5 = arith.constant 0.000000e+00 : f32
    %7 = vector.broadcast %cst_5 : f32 to vector<64x128xf32>
    %8 = arith.maximumf %6, %7 : vector<64x128xf32>
    %c0_6 = arith.constant 0 : index
    %c0_7 = arith.constant 0 : index
    %9 = vector.load %arg4[%c0_6, %c0_7] : memref<64x64xbf16, #tpu.memory_space<vmem>>, vector<64x64xbf16>
    %10 = arith.truncf %8 : vector<64x128xf32> to vector<64x128xbf16>
    %cst_8 = arith.constant dense<0.000000e+00> : vector<64x128xf32>
    %11 = tpu.matmul %9, %10, %cst_8 {dimension_numbers = #tpu.dot_dimension_numbers<[1], [0], [0], [1], [0, 0, 1, 1], [], []>} : vector<64x64xbf16>, vector<64x128xbf16>, vector<64x128xf32> -> vector<64x128xf32>
    %c0_9 = arith.constant 0 : index
    %c0_10 = arith.constant 0 : index
    %12 = vector.load %arg5[%c0_9, %c0_10] : memref<64x1xf32, #tpu.memory_space<vmem>>, vector<64x1xf32>
    %13 = vector.broadcast %12 : vector<64x1xf32> to vector<64x128xf32>
    %14 = arith.addf %11, %13 : vector<64x128xf32>
    %cst_11 = arith.constant 0.000000e+00 : f32
    %15 = vector.broadcast %cst_11 : f32 to vector<64x128xf32>
    %16 = arith.maximumf %14, %15 : vector<64x128xf32>
    %c0_12 = arith.constant 0 : index
    %c0_13 = arith.constant 0 : index
    %17 = vector.load %arg6[%c0_12, %c0_13] : memref<2x64xbf16, #tpu.memory_space<vmem>>, vector<2x64xbf16>
    %18 = arith.truncf %16 : vector<64x128xf32> to vector<64x128xbf16>
    %cst_14 = arith.constant dense<0.000000e+00> : vector<2x128xf32>
    %19 = tpu.matmul %17, %18, %cst_14 {dimension_numbers = #tpu.dot_dimension_numbers<[1], [0], [0], [1], [0, 0, 1, 1], [], []>} : vector<2x64xbf16>, vector<64x128xbf16>, vector<2x128xf32> -> vector<2x128xf32>
    %c0_15 = arith.constant 0 : index
    %c0_16 = arith.constant 0 : index
    %20 = vector.load %arg7[%c0_15, %c0_16] : memref<2x1xf32, #tpu.memory_space<vmem>>, vector<2x1xf32>
    %21 = vector.broadcast %20 : vector<2x1xf32> to vector<2x128xf32>
    %22 = arith.addf %19, %21 : vector<2x128xf32>
    %23 = arith.negf %22 : vector<2x128xf32>
    %24 = math.exp %23 : vector<2x128xf32>
    %cst_17 = arith.constant 1.000000e+00 : f32
    %25 = vector.broadcast %cst_17 : f32 to vector<2x128xf32>
    %26 = arith.addf %25, %24 : vector<2x128xf32>
    %27 = arith.divf %25, %26 : vector<2x128xf32>
    %28 = vector.extract_strided_slice %27 {offsets = [0, 0], sizes = [1, 128], strides = [1, 1]} : vector<2x128xf32> to vector<1x128xf32>
    %c0_18 = arith.constant 0 : index
    %c0_19 = arith.constant 0 : index
    %29 = vector.load %arg8[%c0_18, %c0_19] : memref<2x128xf32, #tpu.memory_space<vmem>>, vector<1x128xf32>
    tpu.vector_store %arg8[%c0_18, %c0_19], %28 {strides = array<i32>} : memref<2x128xf32, #tpu.memory_space<vmem>>, vector<1x128xf32>,
    %30 = vector.extract_strided_slice %27 {offsets = [1, 0], sizes = [1, 128], strides = [1, 1]} : vector<2x128xf32> to vector<1x128xf32>
    %cst_20 = arith.constant 2.000000e+00 : f32
    %31 = vector.broadcast %cst_20 : f32 to vector<1x128xf32>
    %32 = arith.mulf %31, %30 : vector<1x128xf32>
    %cst_21 = arith.constant 1.000000e+00 : f32
    %33 = vector.broadcast %cst_21 : f32 to vector<1x128xf32>
    %34 = arith.subf %32, %33 : vector<1x128xf32>
    %c1 = arith.constant 1 : index
    %c0_22 = arith.constant 0 : index
    %35 = vector.load %arg8[%c1, %c0_22] : memref<2x128xf32, #tpu.memory_space<vmem>>, vector<1x128xf32>
    tpu.vector_store %arg8[%c1, %c0_22], %34 {strides = array<i32>} : memref<2x128xf32, #tpu.memory_space<vmem>>, vector<1x128xf32>,
    return
  }
  func.func @transform_0(%arg0: i32) -> (i32, i32) {
    %c0_i32 = arith.constant 0 : i32
    %c0_i32_0 = arith.constant 0 : i32
    return %arg0, %c0_i32 : i32, i32
  }
  func.func @transform_1(%arg0: i32) -> (i32, i32) {
    %c0_i32 = arith.constant 0 : i32
    %c0_i32_0 = arith.constant 0 : i32
    %c0_i32_1 = arith.constant 0 : i32
    return %c0_i32, %c0_i32_0 : i32, i32
  }
  func.func @transform_2(%arg0: i32) -> (i32, i32) {
    %c0_i32 = arith.constant 0 : i32
    %c0_i32_0 = arith.constant 0 : i32
    %c0_i32_1 = arith.constant 0 : i32
    return %c0_i32, %c0_i32_0 : i32, i32
  }
  func.func @transform_3(%arg0: i32) -> (i32, i32) {
    %c0_i32 = arith.constant 0 : i32
    %c0_i32_0 = arith.constant 0 : i32
    %c0_i32_1 = arith.constant 0 : i32
    return %c0_i32, %c0_i32_0 : i32, i32
  }
  func.func @transform_4(%arg0: i32) -> (i32, i32) {
    %c0_i32 = arith.constant 0 : i32
    %c0_i32_0 = arith.constant 0 : i32
    %c0_i32_1 = arith.constant 0 : i32
    return %c0_i32, %c0_i32_0 : i32, i32
  }
  func.func @transform_5(%arg0: i32) -> (i32, i32) {
    %c0_i32 = arith.constant 0 : i32
    %c0_i32_0 = arith.constant 0 : i32
    %c0_i32_1 = arith.constant 0 : i32
    return %c0_i32, %c0_i32_0 : i32, i32
  }
  func.func @transform_6(%arg0: i32) -> (i32, i32) {
    %c0_i32 = arith.constant 0 : i32
    %c0_i32_0 = arith.constant 0 : i32
    %c0_i32_1 = arith.constant 0 : i32
    return %c0_i32, %c0_i32_0 : i32, i32
  }
  func.func @transform_7(%arg0: i32) -> (i32, i32) {
    %c0_i32 = arith.constant 0 : i32
    %c0_i32_0 = arith.constant 0 : i32
    return %c0_i32, %arg0 : i32, i32
  }
}

</mosaic_0001>

<bundles_post_ra>
// kernel: tpu_custom_call.1
= control target key start
LH: loop header
LB: loop body
LE: loop exit
PB: predicated region body
PF: predicated region fallthrough
CT: control target
= control target key end

     0   :  { %vm128_vm0 = vcmask 261120   ;;  %s688_s0 = inlined_call_operand.vmem [shape: f32[128,32], index: 0, kind: input, shape index: {}]   ;;  %s689_s1 = inlined_call_operand.vmem [shape: bf16[64,32], index: 1, kind: input, shape index: {}]   ;;  %s690_s2 = inlined_call_operand.vmem [shape: f32[64,1], index: 2, kind: input, shape index: {}]   ;;  %s691_s3 = inlined_call_operand.vmem [shape: bf16[64,64], index: 3, kind: input, shape index: {}]   ;;  %s692_s4 = inlined_call_operand.vmem [shape: f32[64,1], index: 4, kind: input, shape index: {}]   ;;  %s693_s5 = inlined_call_operand.vmem [shape: bf16[2,64], index: 5, kind: input, shape index: {}]   ;;  %s694_s6 = inlined_call_operand.vmem [shape: f32[2,1], index: 6, kind: input, shape index: {}]   ;;  %s695_s7 = inlined_call_operand.hbm [shape: f32[2,128], index: 7, kind: output, shape index: {}]  }
   0x1   :  { %v42_v0 = vld [vmem:[%s688_s0 + $0x70] sm:$0xff]  ;;  %v43_v1 = vld [vmem:[%s688_s0 + $0x78] sm:$0xff]  ;;  %v40_v3 = vld [vmem:[%s688_s0 + $0x60] sm:$0xff] }
   0x2   :  { %v51_v2 = vpack.c.bf16 %v43_v1, %v42_v0  ;;  %v41_v4 = vld [vmem:[%s688_s0 + $0x68] sm:$0xff] }
   0x4   :  { %v163_v5 = vsel %vm128_vm0, %v51_v2, 0 }
   0x5   :  { %12 = vsyncpa [#allocation3], 0  ;;  %450 = vmatpush.bf16.xpose.msra.mxu3 %v163_v5  ;;  %165 = vmatpush.bf16.xpose.msra.mxu0 %v163_v5  ;;  %v50_v6 = vpack.c.bf16 %v41_v4, %v40_v3  ;;  %v38_v8 = vld [vmem:[%s688_s0 + $0x50] sm:$0xff]  ;;  %v39_v9 = vld [vmem:[%s688_s0 + $0x58] sm:$0xff]  ;;  %v500_v16 = vmov 0   ;;  %vm282_vm1 = vcmask 523264  }
   0x6   :  { %449 = vmatpush.bf16.xpose.msra.mxu2 %v163_v5  ;;  %v49_v10 = vpack.c.bf16 %v39_v9, %v38_v8  ;;  %v36_v12 = vld [vmem:[%s688_s0 + $0x40] sm:$0xff]  ;;  %v37_v13 = vld [vmem:[%s688_s0 + $0x48] sm:$0xff]  ;;  %v66_v14 = vld [vmem:[%s690_s2 + $0x30] sm:$0xff]  ;;  %467 = vset.pattern.permute.xlu0 %v500_v16  ;;  %s389_s12 = sshll.u32 %s695_s7, 4  ;;  %s390_s12 = int_to_ptr.hbm [resolvable:$true] %s389_s12 }
   0x7   :  { %v160_v7 = vsel %vm128_vm0, %v50_v6, 0  ;;  %v48_v15 = vpack.c.bf16 %v37_v13, %v36_v12  ;;  %100 = vperm.xlu0 %467, %v66_v14   ;;  %468 = vset.pattern.permute.xlu1 %v500_v16  ;;  %v34_v18 = vld [vmem:[%s688_s0 + $0x30] sm:$0xff]  ;;  %v35_v19 = vld [vmem:[%s688_s0 + $0x38] sm:$0xff]  ;;  %v64_v20 = vld [vmem:[%s690_s2 + $0x20] sm:$0xff] }
   0x8   :  { %v157_v11 = vsel %vm128_vm0, %v49_v10, 0  ;;  %469 = vset.pattern.permute.xlu2 %v500_v16  ;;  %v47_v21 = vpack.c.bf16 %v35_v19, %v34_v18  ;;  %90 = vperm.xlu1 %468, %v64_v20   ;;  %v32_v23 = vld [vmem:[%s688_s0 + $0x20] sm:$0xff]  ;;  %v33_v24 = vld [vmem:[%s688_s0 + $0x28] sm:$0xff]  ;;  %v67_v25 = vld [vmem:[%s690_s2 + $0x38] sm:$0xff] }
   0x9   :  { %v154_v17 = vsel %vm128_vm0, %v48_v15, 0  ;;  %v65_v26 = vld [vmem:[%s690_s2 + $0x28] sm:$0xff]  ;;  %v46_v27 = vpack.c.bf16 %v33_v24, %v32_v23  ;;  %v30_v29 = vld [vmem:[%s688_s0 + $0x10] sm:$0xff]  ;;  %v31_v30 = vld [vmem:[%s688_s0 + $0x18] sm:$0xff] }
   0xa   :  { %v151_v22 = vsel %vm128_vm0, %v47_v21, 0  ;;  %v60_v31 = vld [vmem:[%s690_s2] sm:$0xff]  ;;  %v61_v32 = vld [vmem:[%s690_s2 + $0x8] sm:$0xff]  ;;  %v45_v33 = vpack.c.bf16 %v31_v30, %v30_v29  ;;  %v221_v37 = vld [vmem:[%s692_s4 + $0x38] sm:$0xff] }
   0xb   :  { %v148_v28 = vsel %vm128_vm0, %v46_v27, 0  ;;  %v28_v35 = vld [vmem:[%s688_s0] sm:$0xff]  ;;  %v29_v36 = vld [vmem:[%s688_s0 + $0x8] sm:$0xff]  ;;  %v62_v39 = vld [vmem:[%s690_s2 + $0x10] sm:$0xff] }
   0xc   :  { %v145_v34 = vsel %vm128_vm0, %v45_v33, 0  ;;  %v218_v38 = vld [vmem:[%s692_s4 + $0x20] sm:$0xff]  ;;  %v44_v40 = vpack.c.bf16 %v29_v36, %v28_v35  ;;  %80 = vperm.xlu2 %469, %v62_v39   ;;  %v216_v42 = vld [vmem:[%s692_s4 + $0x10] sm:$0xff]  ;;  %v217_v43 = vld [vmem:[%s692_s4 + $0x18] sm:$0xff] }
   0xd   :  { %452 = vmatpush.bf16.xpose.msra.mxu3 %v160_v7  ;;  %166 = vmatpush.bf16.xpose.msra.mxu0 %v160_v7  ;;  %v63_v44 = vld [vmem:[%s690_s2 + $0x18] sm:$0xff]  ;;  %v443_v45 = vld [vmem:[%s689_s1 + $0x10] sm:$0xff]  ;;  %v441_v46 = vld [vmem:[%s689_s1] sm:$0xff] }
   0xe   :  { %451 = vmatpush.bf16.xpose.msra.mxu2 %v160_v7  ;;  %v142_v41 = vsel %vm128_vm0, %v44_v40, 0  ;;  %v442_v47 = vld [vmem:[%s689_s1 + $0x8] sm:$0xff]  ;;  %v337_v49 = vld [vmem:[%s694_s6] sm:$0x3]  ;;  %v220_v50 = vld [vmem:[%s692_s4 + $0x30] sm:$0xff] }
   0xf   :  { %105 = vperm.xlu0 %467, %v67_v25   ;;  %v215_v48 = vld [vmem:[%s692_s4 + $0x8] sm:$0xff]  ;;  %v444_v52 = vld [vmem:[%s689_s1 + $0x18] sm:$0xff]  ;;  %v214_v53 = vld [vmem:[%s692_s4] sm:$0xff] }
  0x10   :  { %95 = vperm.xlu1 %468, %v65_v26   ;;  %v219_v51 = vld [vmem:[%s692_s4 + $0x28] sm:$0xff]  ;;  %v445_v26 = vld [vmem:[%s691_s3] sm:$0xff]  ;;  %v448_v29 = vld [vmem:[%s691_s3 + $0x18] sm:$0xff] }
  0x11   :  { %v446_v27 = vld [vmem:[%s691_s3 + $0x8] sm:$0xff] }
  0x14   :  { %85 = vperm.xlu2 %469, %v63_v44  }
  0x15   :  { %454 = vmatpush.bf16.xpose.msra.mxu3 %v157_v11  ;;  %167 = vmatpush.bf16.xpose.msra.mxu0 %v157_v11 }
  0x16   :  { %453 = vmatpush.bf16.xpose.msra.mxu2 %v157_v11 }
  0x17   :  { %70 = vperm.xlu0 %467, %v60_v31  }
  0x18   :  { %75 = vperm.xlu1 %468, %v61_v32  }
  0x1c   :  { %254 = vperm.xlu2 %469, %v220_v50  }
  0x1d   :  { %456 = vmatpush.bf16.xpose.msra.mxu3 %v154_v17  ;;  %168 = vmatpush.bf16.xpose.msra.mxu0 %v154_v17 }
  0x1e   :  { %455 = vmatpush.bf16.xpose.msra.mxu2 %v154_v17 }
  0x1f   :  { %259 = vperm.xlu0 %467, %v221_v37  }
  0x20   :  { %244 = vperm.xlu1 %468, %v218_v38  }
  0x24   :  { %249 = vperm.xlu2 %469, %v219_v51  }
  0x25   :  { %458 = vmatpush.bf16.xpose.msra.mxu3 %v151_v22  ;;  %169 = vmatpush.bf16.xpose.msra.mxu0 %v151_v22 }
  0x26   :  { %457 = vmatpush.bf16.xpose.msra.mxu2 %v151_v22 }
  0x27   :  { %234 = vperm.xlu0 %467, %v216_v42  }
  0x28   :  { %239 = vperm.xlu1 %468, %v217_v43  }
  0x2c   :  { %224 = vperm.xlu2 %469, %v214_v53  }
  0x2d   :  { %460 = vmatpush.bf16.xpose.msra.mxu3 %v148_v28  ;;  %170 = vmatpush.bf16.xpose.msra.mxu0 %v148_v28 }
  0x2e   :  { %459 = vmatpush.bf16.xpose.msra.mxu2 %v148_v28  ;;  %v447_v28 = vld [vmem:[%s691_s3 + $0x10] sm:$0xff] }
  0x2f   :  { %229 = vperm.xlu0 %467, %v215_v48  }
  0x30   :  { %340 = vperm.xlu1 %468, %v337_v49  }
  0x35   :  { %462 = vmatpush.bf16.xpose.msra.mxu3 %v145_v34  ;;  %171 = vmatpush.bf16.xpose.msra.mxu0 %v145_v34 }
  0x36   :  { %461 = vmatpush.bf16.xpose.msra.mxu2 %v145_v34 }
  0x3d   :  { %464 = vmatpush.bf16.xpose.msra.mxu3 %v142_v41  ;;  %172 = vmatpush.bf16.xpose.msra.mxu0 %v142_v41 }
  0x3e   :  { %463 = vmatpush.bf16.xpose.msra.mxu2 %v142_v41 }
  0x44   :  { %416 = vmatmul.msk.bf16.vlgmr.msra.gmra.mxu3 %vm128_vm0, %v443_v45  ;;  %414 = vmatmul.msk.bf16.vlgmr.msra.gmra.mxu0 %vm128_vm0, %v441_v46 }
  0x45   :  { %415 = vmatmul.msk.bf16.vlgmr.msra.gmra.mxu2 %vm128_vm0, %v442_v47 }
  0x54   :  { %417 = vmatmul.msk.bf16.gmra.mxu3 %vm128_vm0, %v444_v52 }
  0x66   :  { %v81_v60 = vpop.permute.xlu2 %80 }
  0x6e   :  { %v86_v8 = vpop.permute.xlu2 %85 }
  0x76   :  { %v255_v37 = vpop.permute.xlu2 %254 }
  0x79   :  { %v101_v56 = vpop.permute.xlu0 %100 }
  0x7a   :  { %v91_v57 = vpop.permute.xlu1 %90 }
  0x7e   :  { %v250_v42 = vpop.permute.xlu2 %249 }
  0x81   :  { %v106_v62 = vpop.permute.xlu0 %105 }
  0x82   :  { %v96_v63 = vpop.permute.xlu1 %95 }
  0x89   :  { %v71_v14 = vpop.permute.xlu0 %70 }
  0x8a   :  { %v76_v16 = vpop.permute.xlu1 %75 }
  0x91   :  { %v260_v36 = vpop.permute.xlu0 %259 }
  0x92   :  { %v245_v39 = vpop.permute.xlu1 %244 }
  0x99   :  { %v235_v40 = vpop.permute.xlu0 %234 }
  0x9a   :  { %v240_v49 = vpop.permute.xlu1 %239 }
  0xc1   :  { %v174_v61 = vpop.f32.mrf.mxu0 }
  0xc2   :  { %v175_v17 = vadd.f32 %v174_v61, %v71_v14 }
  0xc4   :  { %v194_v22 = vmax.f32 %v175_v17, 0.0 }
  0xc7   :  { %v184_v54 = vpop.f32.mrf.mxu3 }
  0xc8   :  { %v179_v58 = vpop.f32.mrf.mxu2  ;;  %v185_v5 = vadd.f32 %v184_v54, %v91_v57 }
  0xc9   :  { %v180_v10 = vadd.f32 %v179_v58, %v81_v60  ;;  %v176_v13 = vpop.f32.mrf.mxu0 }
  0xca   :  { %v198_v15 = vmax.f32 %v185_v5, 0.0  ;;  %v177_v18 = vadd.f32 %v176_v13, %v76_v16 }
  0xcb   :  { %v196_v19 = vmax.f32 %v180_v10, 0.0 }
  0xcc   :  { %v195_v23 = vmax.f32 %v177_v18, 0.0 }
  0xce   :  { %v210_v25 = vpack.c.bf16 %v195_v23, %v194_v22 }
  0xcf   :  { %v186_v55 = vpop.f32.mrf.mxu3 }
  0xd0   :  { %v187_v2 = vadd.f32 %v186_v55, %v96_v63  ;;  %v181_v4 = vpop.f32.mrf.mxu2  ;;  %v230_v55 = vpop.permute.xlu0 %229 }
  0xd1   :  { %v182_v11 = vadd.f32 %v181_v4, %v86_v8 }
  0xd2   :  { %v199_v9 = vmax.f32 %v187_v2, 0.0  ;;  %v332_v2 = vld [vmem:[%s693_s5] sm:$0x1]  ;;  %s501_s5 = smov [#allocation2]  }
  0xd3   :  { %v197_v20 = vmax.f32 %v182_v11, 0.0  ;;  %s387_s9 = sshll.u32 %s501_s5, 4  ;;  %s388_s9 = int_to_ptr.vmem [resolvable:$true] %s387_s9 }
  0xd4   :  { %v212_v21 = vpack.c.bf16 %v199_v9, %v198_v15 }
  0xd5   :  { %v211_v24 = vpack.c.bf16 %v197_v20, %v196_v19 }
  0xd7   :  { %v189_v59 = vpop.f32.mrf.mxu3 }
  0xd8   :  { %v190_v0 = vadd.f32 %v189_v59, %v101_v56  ;;  %v225_v59 = vpop.permute.xlu2 %224 }
  0xda   :  { %v200_v6 = vmax.f32 %v190_v0, 0.0 }
  0xdf   :  { %v191_v1 = vpop.f32.mrf.mxu3 }
  0xe0   :  { %v192_v3 = vadd.f32 %v191_v1, %v106_v62 }
  0xe2   :  { %v201_v7 = vmax.f32 %v192_v3, 0.0  ;;  %v341_v3 = vpop.permute.xlu1 %340 }
  0xe4   :  { %v213_v12 = vpack.c.bf16 %v201_v7, %v200_v6 }
  0xe6   :  { %299 = vmatpush.bf16.msra.mxu1 %v213_v12 }
  0xea   :  { %300 = vmatpush.bf16.msra.mxu1 %v212_v21 }
  0xee   :  { %301 = vmatpush.bf16.msra.mxu1 %v211_v24 }
  0xf2   :  { %302 = vmatpush.bf16.msra.mxu1 %v210_v25 }
  0xf5   :  { %434 = vmatmul.msk.bf16.vlgmr.msra.gmra.mxu1 %vm282_vm1, %v445_v26 }
 0x105   :  { %435 = vmatmul.msk.bf16.gmra.mxu1 %vm282_vm1, %v446_v27 }
 0x115   :  { %436 = vmatmul.msk.bf16.gmra.mxu1 %vm282_vm1, %v447_v28 }
 0x125   :  { %437 = vmatmul.msk.bf16.gmra.mxu1 %vm282_vm1, %v448_v29 }
 0x172   :  { %v304_v30 = vpop.f32.mrf.mxu1 }
 0x173   :  { %v305_v60 = vadd.f32 %v304_v30, %v225_v59 }
 0x175   :  { %v324_v0 = vmax.f32 %v305_v60, 0.0 }
 0x17a   :  { %v306_v31 = vpop.f32.mrf.mxu1 }
 0x17b   :  { %v307_v56 = vadd.f32 %v306_v31, %v230_v55 }
 0x17d   :  { %v325_v62 = vmax.f32 %v307_v56, 0.0 }
 0x17f   :  { %v333_v1 = vpack.c.bf16 %v325_v62, %v324_v0 }
 0x182   :  { %v309_v32 = vpop.f32.mrf.mxu1 }
 0x183   :  { %v310_v53 = vadd.f32 %v309_v32, %v235_v40 }
 0x185   :  { %v326_v61 = vmax.f32 %v310_v53, 0.0 }
 0x18a   :  { %v311_v33 = vpop.f32.mrf.mxu1 }
 0x18b   :  { %v312_v50 = vadd.f32 %v311_v33, %v240_v49 }
 0x18d   :  { %v327_v57 = vmax.f32 %v312_v50, 0.0 }
 0x18f   :  { %v334_v63 = vpack.c.bf16 %v327_v57, %v326_v61 }
 0x192   :  { %v314_v34 = vpop.f32.mrf.mxu1 }
 0x193   :  { %v315_v46 = vadd.f32 %v314_v34, %v245_v39 }
 0x195   :  { %v328_v54 = vmax.f32 %v315_v46, 0.0 }
 0x19a   :  { %v316_v35 = vpop.f32.mrf.mxu1 }
 0x19b   :  { %v317_v44 = vadd.f32 %v316_v35, %v250_v42 }
 0x19d   :  { %v329_v51 = vmax.f32 %v317_v44, 0.0 }
 0x19f   :  { %v335_v58 = vpack.c.bf16 %v329_v51, %v328_v54 }
 0x1a2   :  { %v319_v38 = vpop.f32.mrf.mxu1 }
 0x1a3   :  { %v320_v41 = vadd.f32 %v319_v38, %v255_v37 }
 0x1a5   :  { %v330_v47 = vmax.f32 %v320_v41, 0.0 }
 0x1aa   :  { %v321_v43 = vpop.f32.mrf.mxu1 }
 0x1ab   :  { %v322_v45 = vadd.f32 %v321_v43, %v260_v36 }
 0x1ad   :  { %v331_v48 = vmax.f32 %v322_v45, 0.0 }
 0x1af   :  { %v336_v52 = vpack.c.bf16 %v331_v48, %v330_v47 }
 0x1b1   :  { %350 = vmatpush.bf16.msrb.mxu2 %v336_v52 }
 0x1b5   :  { %351 = vmatpush.bf16.msrb.mxu2 %v335_v58 }
 0x1b9   :  { %352 = vmatpush.bf16.msrb.mxu2 %v334_v63 }
 0x1bd   :  { %353 = vmatpush.bf16.msrb.mxu2 %v333_v1 }
 0x1c0   :  { %438 = vmatmul.msk.bf16.vlgmr.msrb.gmra.mxu2 %vm282_vm1, %v332_v2 }
 0x243   :  { %v355_v4 = vpop.f32.mrf.mxu2 }
 0x244   :  { %v356_v5 = vadd.f32 %v355_v4, %v341_v3 }
 0x246   :  { %v439_v6 = vmul.f32 -1.442695, %v356_v5 }
 0x248   :  { %470 = vpow2.f32 %v439_v6 }
 0x24b   :  { %v357_v7 = vpop.f32.mrf.mxu2 }
 0x24e   :  { %v471_v8 = vpop.eup %470 }
 0x24f   :  { %v362_v9 = vadd.f32 1.0, %v471_v8 }
 0x251   :  { %472 = vrcp.f32 %v362_v9  ;;  %v374_v13 = vand.u32 2147483648, %v362_v9  ;;  %v372_v15 = vand.u32 2147483647, %v362_v9  ;;  %vm368_vm3 = vweird.f32 %v362_v9 }
 0x253   :  { %v375_v17 = vor.u32 1.1754944e-38, %v374_v13  ;;  %vm373_vm5 = vcmp.eq.f32.partialorder %v372_v15, 8.507059e+37 }
 0x257   :  { %v473_v10 = vpop.eup %472 }
 0x258   :  { %v364_v11 = vmul.f32 %v473_v10, %v362_v9  ;;  %vm369_vm2 = vweird.f32 %v473_v10 }
 0x259   :  { %vm370_vm4 = vmor %vm368_vm3, %vm369_vm2 }
 0x25a   :  { %v365_v12 = vsub.f32 1.0, %v364_v11 }
 0x25c   :  { %v366_v14 = vmul.f32 %v473_v10, %v365_v12 }
 0x25e   :  { %v367_v16 = vadd.f32 %v473_v10, %v366_v14 }
 0x260   :  { %v371_v18 = vsel %vm370_vm4, %v473_v10, %v367_v16 }
 0x261   :  { %v376_v19 = vsel %vm373_vm5, %v375_v17, %v371_v18 }
 0x262   :  { %378 = vst [vmem:[#allocation2] sm:$0x1] %v376_v19  ;;  %v379_v20 = vmul.f32 2.0, %v376_v19 }
 0x264   :  { %v440_v21 = vadd.f32 -1.0, %v379_v20 }
 0x266   :  { %381 = vst [vmem:[#allocation2] sm:$0x2] %v440_v21 }
 0x267   :  { %392 = dma.vmem_to_hbm [thread:$0]  %s388_s9, 32, %s390_s12, [#allocation3]  }
 0x268   :  { %498 = dma.done.wait [#allocation3], 32  }
 0x269   :  { %499 = vsyncadd [#allocation3], 4294967264 }
 0x26a   :  { %397 = vsyncpa [#allocation3], 1 }

</bundles_post_ra>
